<compile_context>
chip_gen: v5e
topology: v5e:2x2
jax: 0.10.0
libtpu: 0.0.40
codegen_flags: <defaults>
</compile_context>

<pallas_src>
import functools

import jax
import jax.numpy as jnp
from jax.experimental import pallas as pl
from jax.experimental.pallas import tpu as pltpu


def _to_2tuple(v):
    return (v, v) if isinstance(v, int) else tuple(v)


def _round_up(x, m):
    return ((x + m - 1) // m) * m


def _patch_proj_kernel(x_ref, w_ref, b_ref, o_ref):
    # x_ref: (TILE_N, K)     patch rows (streamed / pipelined over the grid)
    # w_ref: (K, E_pad)      projection weight (constant index -> VMEM resident)
    # b_ref: (1, E_pad)      bias              (constant index -> VMEM resident)
    # o_ref: (TILE_N, E_pad)
    acc = jnp.dot(x_ref[...], w_ref[...], preferred_element_type=jnp.float32)
    o_ref[...] = (acc + b_ref[...]).astype(o_ref.dtype)  # bias add rides the VPU


def _pick_tile_n(n, k, e_pad, in_itemsize, out_itemsize,
                 budget_bytes=10 * 1024 * 1024):
    """Largest N row-tile whose double-buffered working set fits the VMEM budget."""
    fixed = 2 * k * e_pad * in_itemsize + 2 * e_pad * 4        # resident weight + bias
    per_row = 2 * (k * in_itemsize + e_pad * out_itemsize)     # x tile + out tile, 2x buffered
    t = max(8, (budget_bytes - fixed) // max(per_row, 1))
    t = int(min(t, 1024, _round_up(n, 8)))
    return max(8, (t // 8) * 8)


@functools.partial(
    jax.jit,
    static_argnames=("patch_size", "stride", "flatten", "tile_n", "compute_dtype"))
def patch_embed_new(x, weight, bias, *, patch_size=16, stride=16, flatten="freq",
                    tile_n=None, compute_dtype=None):
    """JAX/Pallas equivalent of PatchEmbed_new.forward.

    Args:
      x:      (B, C, H, W)   NCHW like PyTorch.
      weight: (E, C, ph, pw) Conv2d weight (PyTorch layout).
      bias:   (E,)           Conv2d bias.
      tile_n: rows of the patch matrix per grid step (auto-picked if None).
      compute_dtype: e.g. jnp.bfloat16 to halve input/weight HBM traffic
                     (accumulation stays f32).
    Returns:
      (B, num_patches, E)
    """
    assert flatten in ("time", "freq")
    ph, pw = _to_2tuple(patch_size)
    sh, sw = _to_2tuple(stride)
    # This module only makes sense as a pure patch embed when stride == kernel.
    assert (ph, pw) == (sh, sw), "kernel assumes non-overlapping patches (stride == patch_size)"

    B, C, H, W = x.shape
    E = weight.shape[0]
    gh, gw = H // ph, W // pw
    K = C * ph * pw
    N = B * gh * gw
    out_dtype = x.dtype

    if compute_dtype is not None:
        # Cast before the glue transpose so the memory-bound glue moves fewer bytes.
        x = x.astype(compute_dtype)
        weight = weight.astype(compute_dtype)

    # ---- glue: extract non-overlapping patches (one fused reshape/transpose) ----
    # 'freq': patch order (gh, gw); 'time': patch order (gw, gh) -- both handled by
    # a single permutation, never two stacked transposes.
    perm = (0, 2, 4, 1, 3, 5) if flatten == "freq" else (0, 4, 2, 1, 3, 5)
    patches = x.reshape(B, C, gh, ph, gw, pw).transpose(perm).reshape(N, K)

    # Conv2d weight (E, C, ph, pw) -> (K, E); K flattening order (C, ph, pw) matches
    # the patch flattening above.  Pad E up to a lane-dense multiple of 128.
    E_pad = _round_up(E, 128)
    w_mat = weight.reshape(E, K).T
    b_mat = bias.astype(jnp.float32).reshape(1, E)
    if E_pad != E:
        w_mat = jnp.pad(w_mat, ((0, 0), (0, E_pad - E)))
        b_mat = jnp.pad(b_mat, ((0, 0), (0, E_pad - E)))

    if tile_n is None:
        tile_n = _pick_tile_n(N, K, E_pad,
                              patches.dtype.itemsize,
                              jnp.dtype(out_dtype).itemsize)
    n_tiles = pl.cdiv(N, tile_n)

    cost = pl.CostEstimate(
        flops=2 * N * K * E_pad,
        transcendentals=0,
        bytes_accessed=(N * K * patches.dtype.itemsize
                        + K * E_pad * w_mat.dtype.itemsize
                        + E_pad * 4
                        + N * E_pad * jnp.dtype(out_dtype).itemsize),
    )

    # ---- hot path: pipelined, N-tiled matmul + bias ----
    out = pl.pallas_call(
        _patch_proj_kernel,
        out_shape=jax.ShapeDtypeStruct((N, E_pad), out_dtype),
        grid=(n_tiles,),
        in_specs=[
            pl.BlockSpec((tile_n, K), lambda i: (i, 0)),   # streamed patch rows
            pl.BlockSpec((K, E_pad), lambda i: (0, 0)),    # resident weight
            pl.BlockSpec((1, E_pad), lambda i: (0, 0)),    # resident bias
        ],
        out_specs=pl.BlockSpec((tile_n, E_pad), lambda i: (i, 0)),
        compiler_params=pltpu.CompilerParams(
            dimension_semantics=("parallel",)),
        cost_estimate=cost,
    )(patches, w_mat, b_mat)

    if E_pad != E:
        out = out[:, :E]
    return out.reshape(B, gh * gw, E)


def _reference(x, weight, bias, *, patch_size, stride, flatten):
    """Pure-JAX reference (lax conv, NCHW) mirroring the PyTorch forward."""
    ph, pw = _to_2tuple(patch_size)
    sh, sw = _to_2tuple(stride)
    y = jax.lax.conv_general_dilated(
        x, weight, window_strides=(sh, sw), padding="VALID",
        dimension_numbers=("NCHW", "OIHW", "NCHW"))
    y = y + bias.reshape(1, -1, 1, 1)
    if flatten == "freq":
        B, E, gh, gw = y.shape
        y = y.reshape(B, E, gh * gw).transpose(0, 2, 1)
    else:
        y = jnp.swapaxes(y, -2, -1)
        B, E, gw, gh = y.shape
        y = y.reshape(B, E, gw * gh).transpose(0, 2, 1)
    return y


if __name__ == "__main__":
    # Small, module-consistent shapes:
    #   batch=2, in_chans=4, img 16x16, patch_size=stride=8, embed_dim=32
    B, C, H, W = 2, 4, 16, 16
    patch, stride, E = 8, 8, 32

    key = jax.random.PRNGKey(0)
    kx, kw, kb = jax.random.split(key, 3)
    x = jax.random.normal(kx, (B, C, H, W), dtype=jnp.float32)
    weight = jax.random.normal(kw, (E, C, patch, patch), dtype=jnp.float32) * 0.02
    bias = jax.random.normal(kb, (E,), dtype=jnp.float32) * 0.01

    ok = True
    for flatten in ("freq", "time"):
        ref = _reference(x, weight, bias,
                         patch_size=patch, stride=stride, flatten=flatten)

        # f32 path: exact-ish match.
        out = patch_embed_new(x, weight, bias,
                              patch_size=patch, stride=stride, flatten=flatten)
        out = jax.block_until_ready(out)
        if out.shape != ref.shape or not jnp.allclose(out, ref, atol=1e-4, rtol=1e-4):
            ok = False

        # bf16-input path (f32 accumulation): loose tolerance.
        out_bf16 = patch_embed_new(x, weight, bias,
                                   patch_size=patch, stride=stride, flatten=flatten,
                                   compute_dtype=jnp.bfloat16)
        out_bf16 = jax.block_until_ready(out_bf16)
        if out_bf16.shape != ref.shape or not jnp.allclose(out_bf16, ref,
                                                           atol=5e-2, rtol=5e-2):
            ok = False

    if ok:
        print("KERNEL_OK")
</pallas_src>

<mosaic_0001>
module attributes {stable_mosaic.version = 11 : i64} {
  func.func @_patch_proj_kernel(%arg0: i32, %arg1: memref<8x256xf32, #tpu.memory_space<vmem>>, %arg2: memref<256x128xf32, #tpu.memory_space<vmem>>, %arg3: memref<1x128xf32, #tpu.memory_space<vmem>>, %arg4: memref<8x128xf32, #tpu.memory_space<vmem>>) attributes {dimension_semantics = [#tpu.dimension_semantics<parallel>], iteration_bounds = array<i64: 1>, scalar_prefetch = 0 : i64, scratch_operands = 0 : i64, tpu.core_type = #tpu.core_type<tc>, window_params = [{transform_indices = @transform_0, window_bounds = array<i64: 8, 256>}, {pipeline_mode = #tpu.pipeline_mode<synchronous>, transform_indices = @transform_1, window_bounds = array<i64: 256, 128>}, {pipeline_mode = #tpu.pipeline_mode<synchronous>, transform_indices = @transform_2, window_bounds = array<i64: 1, 128>}, {transform_indices = @transform_3, window_bounds = array<i64: 8, 128>}]} {
    %c0 = arith.constant 0 : index
    %c0_0 = arith.constant 0 : index
    %0 = vector.load %arg1[%c0, %c0_0] : memref<8x256xf32, #tpu.memory_space<vmem>>, vector<8x256xf32>
    %c0_1 = arith.constant 0 : index
    %c0_2 = arith.constant 0 : index
    %1 = vector.load %arg2[%c0_1, %c0_2] : memref<256x128xf32, #tpu.memory_space<vmem>>, vector<256x128xf32>
    %cst = arith.constant dense<0.000000e+00> : vector<8x128xf32>
    %2 = tpu.matmul %0, %1, %cst {dimension_numbers = #tpu.dot_dimension_numbers<[1], [0], [0], [1], [0, 0, 1, 1], [], []>} : vector<8x256xf32>, vector<256x128xf32>, vector<8x128xf32> -> vector<8x128xf32>
    %c0_3 = arith.constant 0 : index
    %c0_4 = arith.constant 0 : index
    %3 = vector.load %arg3[%c0_3, %c0_4] : memref<1x128xf32, #tpu.memory_space<vmem>>, vector<1x128xf32>
    %4 = vector.broadcast %3 : vector<1x128xf32> to vector<8x128xf32>
    %5 = arith.addf %2, %4 : vector<8x128xf32>
    %c0_5 = arith.constant 0 : index
    %c0_6 = arith.constant 0 : index
    %6 = vector.load %arg4[%c0_5, %c0_6] : memref<8x128xf32, #tpu.memory_space<vmem>>, vector<8x128xf32>
    tpu.vector_store %arg4[%c0_5, %c0_6], %5 {strides = array<i32>} : memref<8x128xf32, #tpu.memory_space<vmem>>, vector<8x128xf32>,
    return
  }
  func.func @transform_0(%arg0: i32) -> (i32, i32) {
    %c0_i32 = arith.constant 0 : i32
    %c0_i32_0 = arith.constant 0 : i32
    return %arg0, %c0_i32 : i32, i32
  }
  func.func @transform_1(%arg0: i32) -> (i32, i32) {
    %c0_i32 = arith.constant 0 : i32
    %c0_i32_0 = arith.constant 0 : i32
    %c0_i32_1 = arith.constant 0 : i32
    return %c0_i32, %c0_i32_0 : i32, i32
  }
  func.func @transform_2(%arg0: i32) -> (i32, i32) {
    %c0_i32 = arith.constant 0 : i32
    %c0_i32_0 = arith.constant 0 : i32
    %c0_i32_1 = arith.constant 0 : i32
    return %c0_i32, %c0_i32_0 : i32, i32
  }
  func.func @transform_3(%arg0: i32) -> (i32, i32) {
    %c0_i32 = arith.constant 0 : i32
    %c0_i32_0 = arith.constant 0 : i32
    return %arg0, %c0_i32 : i32, i32
  }
}

</mosaic_0001>

<bundles_post_ra>
// kernel: patch_embed_new.1
= control target key start
LH: loop header
LB: loop body
LE: loop exit
PB: predicated region body
PF: predicated region fallthrough
CT: control target
= control target key end

     0   :  { %s267_s0 = inlined_call_operand.vmem [shape: f32[8,256], index: 0, kind: input, shape index: {}]   ;;  %s268_s1 = inlined_call_operand.vmem [shape: f32[256,128], index: 1, kind: input, shape index: {}]   ;;  %s269_s2 = inlined_call_operand.vmem [shape: f32[1,128], index: 2, kind: input, shape index: {}]   ;;  %s270_s3 = inlined_call_operand.hbm [shape: f32[8,128], index: 3, kind: output, shape index: {}]  }
   0x1   :  { %v32_v0 = vld [vmem:[%s268_s1 + $0x78] sm:$0xff]  ;;  %v31_v1 = vld [vmem:[%s268_s1 + $0x70] sm:$0xff]  ;;  %v30_v4 = vld [vmem:[%s268_s1 + $0x68] sm:$0xff] }
   0x2   :  { %v48_v2 = vld [vmem:[%s268_s1 + $0xf8] sm:$0xff]  ;;  %53 = vmatpush.msra.mxu0 %v32_v0  ;;  %v47_v3 = vld [vmem:[%s268_s1 + $0xf0] sm:$0xff]  ;;  %v46_v5 = vld [vmem:[%s268_s1 + $0xe8] sm:$0xff] }
   0x3   :  { %73 = vmatpush.msra.mxu1 %v48_v2  ;;  %v29_v6 = vld [vmem:[%s268_s1 + $0x60] sm:$0xff]  ;;  %v28_v8 = vld [vmem:[%s268_s1 + $0x58] sm:$0xff]  ;;  %v27_v10 = vld [vmem:[%s268_s1 + $0x50] sm:$0xff] }
   0x4   :  { %54 = vmatpush.msra.mxu0 %v31_v1  ;;  %v45_v7 = vld [vmem:[%s268_s1 + $0xe0] sm:$0xff]  ;;  %v44_v9 = vld [vmem:[%s268_s1 + $0xd8] sm:$0xff]  ;;  %v43_v11 = vld [vmem:[%s268_s1 + $0xd0] sm:$0xff] }
   0x5   :  { %74 = vmatpush.msra.mxu1 %v47_v3  ;;  %v26_v12 = vld [vmem:[%s268_s1 + $0x48] sm:$0xff]  ;;  %v25_v14 = vld [vmem:[%s268_s1 + $0x40] sm:$0xff] }
   0x6   :  { %55 = vmatpush.msra.mxu0 %v30_v4  ;;  %v42_v13 = vld [vmem:[%s268_s1 + $0xc8] sm:$0xff]  ;;  %v41_v15 = vld [vmem:[%s268_s1 + $0xc0] sm:$0xff] }
   0x7   :  { %75 = vmatpush.msra.mxu1 %v46_v5 }
   0x8   :  { %56 = vmatpush.msra.mxu0 %v29_v6 }
   0x9   :  { %76 = vmatpush.msra.mxu1 %v45_v7 }
   0xa   :  { %57 = vmatpush.msra.mxu0 %v28_v8 }
   0xb   :  { %77 = vmatpush.msra.mxu1 %v44_v9 }
   0xc   :  { %58 = vmatpush.msra.mxu0 %v27_v10 }
   0xd   :  { %78 = vmatpush.msra.mxu1 %v43_v11 }
   0xe   :  { %8 = vsyncpa [#allocation3], 0  ;;  %59 = vmatpush.msra.mxu0 %v26_v12  ;;  %v24_v16 = vld [vmem:[%s268_s1 + $0x38] sm:$0xff]  ;;  %v23_v18 = vld [vmem:[%s268_s1 + $0x30] sm:$0xff]  ;;  %s101_s4 = sshll.u32 %s270_s3, 4  ;;  %s102_s4 = int_to_ptr.hbm [resolvable:$true] %s101_s4 }
   0xf   :  { %79 = vmatpush.msra.mxu1 %v42_v13  ;;  %v40_v17 = vld [vmem:[%s268_s1 + $0xb8] sm:$0xff]  ;;  %v39_v19 = vld [vmem:[%s268_s1 + $0xb0] sm:$0xff]  ;;  %v22_v20 = vld [vmem:[%s268_s1 + $0x28] sm:$0xff] }
  0x10   :  { %60 = vmatpush.msra.mxu0 %v25_v14  ;;  %v38_v21 = vld [vmem:[%s268_s1 + $0xa8] sm:$0xff]  ;;  %v21_v22 = vld [vmem:[%s268_s1 + $0x20] sm:$0xff]  ;;  %v20_v24 = vld [vmem:[%s268_s1 + $0x18] sm:$0xff] }
  0x11   :  { %80 = vmatpush.msra.mxu1 %v41_v15  ;;  %v37_v23 = vld [vmem:[%s268_s1 + $0xa0] sm:$0xff]  ;;  %v36_v25 = vld [vmem:[%s268_s1 + $0x98] sm:$0xff]  ;;  %v19_v26 = vld [vmem:[%s268_s1 + $0x10] sm:$0xff] }
  0x12   :  { %61 = vmatpush.msra.mxu0 %v24_v16  ;;  %v35_v27 = vld [vmem:[%s268_s1 + $0x90] sm:$0xff]  ;;  %v18_v28 = vld [vmem:[%s268_s1 + $0x8] sm:$0xff]  ;;  %v17_v30 = vld [vmem:[%s268_s1] sm:$0xff] }
  0x13   :  { %81 = vmatpush.msra.mxu1 %v40_v17  ;;  %v34_v29 = vld [vmem:[%s268_s1 + $0x88] sm:$0xff]  ;;  %v33_v31 = vld [vmem:[%s268_s1 + $0x80] sm:$0xff]  ;;  %s138_s1 = smov [#allocation2]  }
  0x14   :  { %62 = vmatpush.msra.mxu0 %v23_v18  ;;  %v15_v32 = vld [vmem:[%s267_s0] sm:$0xff]  ;;  %v16_v33 = vld [vmem:[%s267_s0 + $0x8] sm:$0xff]  ;;  %s99_s28 = sshll.u32 %s138_s1, 4  ;;  %s100_s28 = int_to_ptr.vmem [resolvable:$true] %s99_s28 }
  0x15   :  { %82 = vmatpush.msra.mxu1 %v39_v19  ;;  %v111_v34 = vld [vmem:[%s269_s2] ss:$0 sm:$0xff] }
  0x16   :  { %63 = vmatpush.msra.mxu0 %v22_v20 }
  0x17   :  { %83 = vmatpush.msra.mxu1 %v38_v21 }
  0x18   :  { %64 = vmatpush.msra.mxu0 %v21_v22 }
  0x19   :  { %84 = vmatpush.msra.mxu1 %v37_v23 }
  0x1a   :  { %65 = vmatpush.msra.mxu0 %v20_v24 }
  0x1b   :  { %85 = vmatpush.msra.mxu1 %v36_v25 }
  0x1c   :  { %66 = vmatpush.msra.mxu0 %v19_v26 }
  0x1d   :  { %86 = vmatpush.msra.mxu1 %v35_v27 }
  0x1e   :  { %67 = vmatpush.msra.mxu0 %v18_v28 }
  0x1f   :  { %87 = vmatpush.msra.mxu1 %v34_v29 }
  0x20   :  { %68 = vmatpush.msra.mxu0 %v17_v30 }
  0x21   :  { %88 = vmatpush.msra.mxu1 %v33_v31  ;;  %69 = vmatmul.f32.vlgmr.msra.gmra.mxu0 %v15_v32 }
  0x22   :  { %89 = vmatmul.f32.vlgmr.msra.gmra.mxu1 %v16_v33 }
  0x9e   :  { %v70_v35 = vpop.f32.mrf.mxu0 }
  0x9f   :  { %v90_v36 = vpop.f32.mrf.mxu1  ;;  %v71_v37 = vadd.f32 %v111_v34, %v70_v35 }
  0xa1   :  { %v91_v38 = vadd.f32 %v90_v36, %v71_v37 }
  0xa3   :  { %93 = vst [vmem:[#allocation2] sm:$0xff] %v91_v38 }
  0xa4   :  { %104 = dma.vmem_to_hbm [thread:$0]  %s100_s28, 128, %s102_s4, [#allocation3]  }
  0xa5   :  { %136 = dma.done.wait [#allocation3], 128  }
  0xa6   :  { %137 = vsyncadd [#allocation3], 4294967168 }
  0xa7   :  { %109 = vsyncpa [#allocation3], 1 }

</bundles_post_ra>
